<compile_context>
chip_gen: v6e
topology: v6e:2x2x1
jax: 0.10.0
libtpu: 0.0.40
codegen_flags: <defaults>
</compile_context>

<pallas_src>
import jax
import jax.numpy as jnp
from jax.experimental import pallas as pl
from jax.experimental.pallas import tpu as pltpu

IN_DIM = 3
HIDDEN = 64
OUT_DIM = 28 * 28          # 784


def decoder_kernel(x_ref, w1_ref, b1_ref, w2_ref, b2_ref, o_ref):
    x = x_ref[...]                       # (TB, 3) f32
    # Linear(3 -> 64) as VPU broadcast-FMAs (avoids a K=3 padded MXU matmul).
    h = (x[:, 0:1] * w1_ref[0:1, :]
         + x[:, 1:2] * w1_ref[1:2, :]
         + x[:, 2:3] * w1_ref[2:3, :]
         + b1_ref[...])                  # (TB, 64), b1 broadcasts over batch
    h = jnp.maximum(h, 0.0)              # ReLU
    # Linear(64 -> 784) on the MXU, f32 accumulate; bias fused on the drain.
    out = jnp.dot(h, w2_ref[...], preferred_element_type=jnp.float32)
    o_ref[...] = (out + b2_ref[...]).astype(o_ref.dtype)


def _round_up(n, m):
    return ((n + m - 1) // m) * m


def decoder_forward(x, w1, b1, w2, b2, *, block_b=1024):
    """x: (B, 3) f32; w1: (3, 64); b1: (1, 64); w2: (64, 784); b2: (1, 784)."""
    B = x.shape[0]
    block_b = max(8, _round_up(block_b, 8))
    B_r8 = _round_up(B, 8)

    if B_r8 <= block_b:
        # Whole batch fits in one tile: split into 2 blocks (>=8 rows each) so
        # both TensorCores on v7x megacore get work when there is enough batch.
        TB = _round_up(max(B_r8 // 2, 8), 8) if B_r8 >= 16 else B_r8
    else:
        TB = block_b

    n_blocks = pl.cdiv(B_r8, TB)
    B_pad = n_blocks * TB
    if B_pad != B:
        x = jnp.pad(x, ((0, B_pad - B), (0, 0)))

    flops = 2 * B_pad * (IN_DIM * HIDDEN + HIDDEN * OUT_DIM)
    bytes_accessed = 4 * (B_pad * (IN_DIM + OUT_DIM)
                          + IN_DIM * HIDDEN + HIDDEN
                          + HIDDEN * OUT_DIM + OUT_DIM)

    # Double-buffered output tile + x tile + resident weights, with headroom.
    vmem_bytes = 2 * (TB * OUT_DIM + TB * IN_DIM) * 4 \
        + (IN_DIM * HIDDEN + HIDDEN + HIDDEN * OUT_DIM + OUT_DIM) * 4
    compiler_kwargs = dict(dimension_semantics=("parallel",))
    if vmem_bytes > 12 * 1024 * 1024:
        compiler_kwargs["vmem_limit_bytes"] = int(vmem_bytes * 2)

    out = pl.pallas_call(
        decoder_kernel,
        out_shape=jax.ShapeDtypeStruct((B_pad, OUT_DIM), jnp.float32),
        grid_spec=pltpu.PrefetchScalarGridSpec(
            num_scalar_prefetch=0,
            grid=(n_blocks,),
            in_specs=[
                pl.BlockSpec((TB, IN_DIM), lambda i: (i, 0)),       # x tile
                pl.BlockSpec((IN_DIM, HIDDEN), lambda i: (0, 0)),   # w1 (resident)
                pl.BlockSpec((1, HIDDEN), lambda i: (0, 0)),        # b1 (resident)
                pl.BlockSpec((HIDDEN, OUT_DIM), lambda i: (0, 0)),  # w2 (resident)
                pl.BlockSpec((1, OUT_DIM), lambda i: (0, 0)),       # b2 (resident)
            ],
            out_specs=pl.BlockSpec((TB, OUT_DIM), lambda i: (i, 0)),
        ),
        compiler_params=pltpu.CompilerParams(**compiler_kwargs),
        cost_estimate=pl.CostEstimate(
            flops=flops, transcendentals=0, bytes_accessed=bytes_accessed),
    )(x, w1, b1, w2, b2)

    return out if B_pad == B else out[:B]


def init_params(key):
    """Deterministic init mimicking torch.nn.Linear default (uniform ±1/sqrt(fan_in)).

    Weights are stored transposed relative to PyTorch (in_features, out_features)
    so the kernel can do x @ W directly.
    """
    k1, k2, k3, k4 = jax.random.split(key, 4)
    bound1 = 1.0 / jnp.sqrt(IN_DIM)
    bound2 = 1.0 / jnp.sqrt(HIDDEN)
    w1 = jax.random.uniform(k1, (IN_DIM, HIDDEN), jnp.float32, -bound1, bound1)
    b1 = jax.random.uniform(k2, (1, HIDDEN), jnp.float32, -bound1, bound1)
    w2 = jax.random.uniform(k3, (HIDDEN, OUT_DIM), jnp.float32, -bound2, bound2)
    b2 = jax.random.uniform(k4, (1, OUT_DIM), jnp.float32, -bound2, bound2)
    return w1, b1, w2, b2


def decoder_ref(x, w1, b1, w2, b2):
    h = jnp.maximum(x @ w1 + b1, 0.0)
    return h @ w2 + b2


if __name__ == "__main__":
    key = jax.random.PRNGKey(0)
    kx, kp = jax.random.split(key)
    w1, b1, w2, b2 = init_params(kp)

    # Small primary test: B = 8 (single grid block path).
    B = 8
    x = jax.random.normal(kx, (B, IN_DIM), jnp.float32)
    out = jax.block_until_ready(decoder_forward(x, w1, b1, w2, b2))
    ref = decoder_ref(x, w1, b1, w2, b2)
    assert out.shape == (B, OUT_DIM), out.shape
    assert jnp.allclose(out, ref, atol=1e-5, rtol=1e-5), "mismatch vs JAX reference (B=8)"

    # Multi-block / padded-batch path (2 blocks -> exercises megacore split).
    B2 = 20
    x2 = jax.random.normal(jax.random.fold_in(kx, 1), (B2, IN_DIM), jnp.float32)
    out2 = jax.block_until_ready(decoder_forward(x2, w1, b1, w2, b2, block_b=16))
    ref2 = decoder_ref(x2, w1, b1, w2, b2)
    assert out2.shape == (B2, OUT_DIM), out2.shape
    assert jnp.allclose(out2, ref2, atol=1e-5, rtol=1e-5), "mismatch vs JAX reference (B=20)"

    # Single-tile batch that auto-splits into >=2 blocks (both TCs on v7x).
    B3 = 48
    x3 = jax.random.normal(jax.random.fold_in(kx, 2), (B3, IN_DIM), jnp.float32)
    out3 = jax.block_until_ready(decoder_forward(x3, w1, b1, w2, b2))
    ref3 = decoder_ref(x3, w1, b1, w2, b2)
    assert out3.shape == (B3, OUT_DIM), out3.shape
    assert jnp.allclose(out3, ref3, atol=1e-5, rtol=1e-5), "mismatch vs JAX reference (B=48)"

    print("KERNEL_OK")
</pallas_src>

<mosaic_0001>
module attributes {stable_mosaic.version = 11 : i64} {
  func.func @decoder_kernel(%arg0: i32, %arg1: memref<8x3xf32, #tpu.memory_space<vmem>>, %arg2: memref<3x64xf32, #tpu.memory_space<vmem>>, %arg3: memref<1x64xf32, #tpu.memory_space<vmem>>, %arg4: memref<64x784xf32, #tpu.memory_space<vmem>>, %arg5: memref<1x784xf32, #tpu.memory_space<vmem>>, %arg6: memref<8x784xf32, #tpu.memory_space<vmem>>) attributes {dimension_semantics = [#tpu.dimension_semantics<parallel>], iteration_bounds = array<i64: 1>, scalar_prefetch = 0 : i64, scratch_operands = 0 : i64, tpu.core_type = #tpu.core_type<tc>, window_params = [{transform_indices = @transform_0, window_bounds = array<i64: 8, 3>}, {pipeline_mode = #tpu.pipeline_mode<synchronous>, transform_indices = @transform_1, window_bounds = array<i64: 3, 64>}, {pipeline_mode = #tpu.pipeline_mode<synchronous>, transform_indices = @transform_2, window_bounds = array<i64: 1, 64>}, {pipeline_mode = #tpu.pipeline_mode<synchronous>, transform_indices = @transform_3, window_bounds = array<i64: 64, 784>}, {pipeline_mode = #tpu.pipeline_mode<synchronous>, transform_indices = @transform_4, window_bounds = array<i64: 1, 784>}, {transform_indices = @transform_5, window_bounds = array<i64: 8, 784>}]} {
    %c0 = arith.constant 0 : index
    %c0_0 = arith.constant 0 : index
    %0 = vector.load %arg1[%c0, %c0_0] : memref<8x3xf32, #tpu.memory_space<vmem>>, vector<8x3xf32>
    %1 = vector.extract_strided_slice %0 {offsets = [0, 0], sizes = [8, 1], strides = [1, 1]} : vector<8x3xf32> to vector<8x1xf32>
    %c0_1 = arith.constant 0 : index
    %c0_2 = arith.constant 0 : index
    %2 = vector.load %arg2[%c0_1, %c0_2] : memref<3x64xf32, #tpu.memory_space<vmem>>, vector<1x64xf32>
    %3 = vector.broadcast %1 : vector<8x1xf32> to vector<8x64xf32>
    %4 = vector.broadcast %2 : vector<1x64xf32> to vector<8x64xf32>
    %5 = arith.mulf %3, %4 : vector<8x64xf32>
    %6 = vector.extract_strided_slice %0 {offsets = [0, 1], sizes = [8, 1], strides = [1, 1]} : vector<8x3xf32> to vector<8x1xf32>
    %c1 = arith.constant 1 : index
    %c0_3 = arith.constant 0 : index
    %7 = vector.load %arg2[%c1, %c0_3] : memref<3x64xf32, #tpu.memory_space<vmem>>, vector<1x64xf32>
    %8 = vector.broadcast %6 : vector<8x1xf32> to vector<8x64xf32>
    %9 = vector.broadcast %7 : vector<1x64xf32> to vector<8x64xf32>
    %10 = arith.mulf %8, %9 : vector<8x64xf32>
    %11 = arith.addf %5, %10 : vector<8x64xf32>
    %12 = vector.extract_strided_slice %0 {offsets = [0, 2], sizes = [8, 1], strides = [1, 1]} : vector<8x3xf32> to vector<8x1xf32>
    %c2 = arith.constant 2 : index
    %c0_4 = arith.constant 0 : index
    %13 = vector.load %arg2[%c2, %c0_4] : memref<3x64xf32, #tpu.memory_space<vmem>>, vector<1x64xf32>
    %14 = vector.broadcast %12 : vector<8x1xf32> to vector<8x64xf32>
    %15 = vector.broadcast %13 : vector<1x64xf32> to vector<8x64xf32>
    %16 = arith.mulf %14, %15 : vector<8x64xf32>
    %17 = arith.addf %11, %16 : vector<8x64xf32>
    %c0_5 = arith.constant 0 : index
    %c0_6 = arith.constant 0 : index
    %18 = vector.load %arg3[%c0_5, %c0_6] : memref<1x64xf32, #tpu.memory_space<vmem>>, vector<1x64xf32>
    %19 = vector.broadcast %18 : vector<1x64xf32> to vector<8x64xf32>
    %20 = arith.addf %17, %19 : vector<8x64xf32>
    %cst = arith.constant 0.000000e+00 : f32
    %21 = vector.broadcast %cst : f32 to vector<8x64xf32>
    %22 = arith.maximumf %20, %21 : vector<8x64xf32>
    %c0_7 = arith.constant 0 : index
    %c0_8 = arith.constant 0 : index
    %23 = vector.load %arg4[%c0_7, %c0_8] : memref<64x784xf32, #tpu.memory_space<vmem>>, vector<64x784xf32>
    %cst_9 = arith.constant dense<0.000000e+00> : vector<8x784xf32>
    %24 = tpu.matmul %22, %23, %cst_9 {dimension_numbers = #tpu.dot_dimension_numbers<[1], [0], [0], [1], [0, 0, 1, 1], [], []>} : vector<8x64xf32>, vector<64x784xf32>, vector<8x784xf32> -> vector<8x784xf32>
    %c0_10 = arith.constant 0 : index
    %c0_11 = arith.constant 0 : index
    %25 = vector.load %arg5[%c0_10, %c0_11] : memref<1x784xf32, #tpu.memory_space<vmem>>, vector<1x784xf32>
    %26 = vector.broadcast %25 : vector<1x784xf32> to vector<8x784xf32>
    %27 = arith.addf %24, %26 : vector<8x784xf32>
    %c0_12 = arith.constant 0 : index
    %c0_13 = arith.constant 0 : index
    %28 = vector.load %arg6[%c0_12, %c0_13] : memref<8x784xf32, #tpu.memory_space<vmem>>, vector<8x784xf32>
    tpu.vector_store %arg6[%c0_12, %c0_13], %27 {strides = array<i32>} : memref<8x784xf32, #tpu.memory_space<vmem>>, vector<8x784xf32>,
    return
  }
  func.func @transform_0(%arg0: i32) -> (i32, i32) {
    %c0_i32 = arith.constant 0 : i32
    %c0_i32_0 = arith.constant 0 : i32
    return %arg0, %c0_i32 : i32, i32
  }
  func.func @transform_1(%arg0: i32) -> (i32, i32) {
    %c0_i32 = arith.constant 0 : i32
    %c0_i32_0 = arith.constant 0 : i32
    %c0_i32_1 = arith.constant 0 : i32
    return %c0_i32, %c0_i32_0 : i32, i32
  }
  func.func @transform_2(%arg0: i32) -> (i32, i32) {
    %c0_i32 = arith.constant 0 : i32
    %c0_i32_0 = arith.constant 0 : i32
    %c0_i32_1 = arith.constant 0 : i32
    return %c0_i32, %c0_i32_0 : i32, i32
  }
  func.func @transform_3(%arg0: i32) -> (i32, i32) {
    %c0_i32 = arith.constant 0 : i32
    %c0_i32_0 = arith.constant 0 : i32
    %c0_i32_1 = arith.constant 0 : i32
    return %c0_i32, %c0_i32_0 : i32, i32
  }
  func.func @transform_4(%arg0: i32) -> (i32, i32) {
    %c0_i32 = arith.constant 0 : i32
    %c0_i32_0 = arith.constant 0 : i32
    %c0_i32_1 = arith.constant 0 : i32
    return %c0_i32, %c0_i32_0 : i32, i32
  }
  func.func @transform_5(%arg0: i32) -> (i32, i32) {
    %c0_i32 = arith.constant 0 : i32
    %c0_i32_0 = arith.constant 0 : i32
    return %arg0, %c0_i32 : i32, i32
  }
}

</mosaic_0001>

<bundles_post_ra>
// kernel: tpu_custom_call.1
= control target key start
LH: loop header
LB: loop body
LE: loop exit
PB: predicated region body
PF: predicated region fallthrough
CT: control target
= control target key end

     0   :  { %10 = vsyncpa [#allocation3], 0  ;;  %s655_s0 = inlined_call_operand.vmem [shape: f32[8,3], index: 0, kind: input, shape index: {}]   ;;  %s656_s1 = inlined_call_operand.vmem [shape: f32[3,64], index: 1, kind: input, shape index: {}]   ;;  %s657_s2 = inlined_call_operand.vmem [shape: f32[1,64], index: 2, kind: input, shape index: {}]   ;;  %s658_s3 = inlined_call_operand.hbm [shape: f32[64,784], index: 3, kind: input, shape index: {}]   ;;  %s659_s4 = inlined_call_operand.vmem [shape: f32[1,784], index: 4, kind: input, shape index: {}]   ;;  %s660_s5 = inlined_call_operand.hbm [shape: f32[8,784], index: 5, kind: output, shape index: {}]  }
   0x1   :  { %11 = vsyncpa [#allocation4], 0  ;;  %s574_s18 = smov [#allocation2]  }
   0x2   :  { %s23_s19 = sshll.u32 %s574_s18, 4  ;;  %s24_s19 = int_to_ptr.vmem [resolvable:$true] %s23_s19 }
   0x3   :  { %s538_s20 = scalar_lea.vmem %s24_s19, 7168  ;;  %p543_p1 = scmp.lt.s32.totalorder %s24_s19, %s24_s19 }
   0x4   :  { %p539_p0 = scmp.ne.s32.totalorder %s24_s19, %s538_s20  ;;  %p544_p2 = scmp.lt.s32.totalorder %s538_s20, %s538_s20 }
   0x6   :  { %p545_p3 = por %p544_p2, %p543_p1 }
   0x8   :  { %p546_p4 = pnand %p545_p3, %p539_p0 }
   0xa   :  { %549 = shalt.err (!%p546_p4)
}
   0xb   :  { %s575_s21 = smov 896   ;;  %s576_s22 = smov 56  }
   0xc   :  { %29 = dma.hbm_to_vmem [thread:$0]  %s658_s3, 7168, %s24_s19, [#allocation3], %s575_s21, %s575_s21, %s576_s22  }
   0xd   :  { %570 = dma.done.wait [#allocation3], 7168  }
   0xe   :  { %571 = vsyncadd [#allocation3], 4294960128  ;;  %v577_v0 = vmov 0   ;;  %v578_v1 = vmov 2   ;;  %v35_v2 = vld [vmem:[%s655_s0] sm:$0xff]  ;;  %v128_v3 = vld [vmem:[#allocation2 + $0x190] sm:$0xff] }
   0xf   :  { %526 = vset.pattern.permute.xlu0 %v577_v0  ;;  %528 = vset.pattern.permute.xlu1 %v578_v1  ;;  %v130_v4 = vld [vmem:[#allocation2 + $0x1a0] sm:$0xff]  ;;  %v127_v5 = vld [vmem:[#allocation2 + $0x188] sm:$0xff]  ;;  %v129_v6 = vld [vmem:[#allocation2 + $0x198] sm:$0xff]  ;;  %v579_v13 = vmov 1   ;;  %v580_v37 = vmov 0.0   ;;  %vm171_vm0 = vcmask 523264  }
  0x10   :  { %39 = vperm.xlu0 %526, %v35_v2   ;;  %60 = vperm.xlu1 %528, %v35_v2   ;;  %v121_v7 = vld [vmem:[#allocation2 + $0x158] sm:$0xff]  ;;  %v123_v8 = vld [vmem:[#allocation2 + $0x168] sm:$0xff]  ;;  %v120_v9 = vld [vmem:[#allocation2 + $0x150] sm:$0xff]  ;;  %vm581_vm1 = vmmov 0   ;;  %vm464_vm2 = vcmask 130048  }
  0x11   :  { %191 = vmatprep.subr.mxu0 %v128_v3  ;;  %262 = vmatprep.subr.mxu1 %v130_v4  ;;  %v122_v10 = vld [vmem:[#allocation2 + $0x160] sm:$0xff]  ;;  %v116_v12 = vld [vmem:[#allocation2 + $0x130] sm:$0xff]  ;;  %v113_v14 = vld [vmem:[#allocation2 + $0x118] sm:$0xff] }
  0x12   :  { %192 = vmatpush1.msra.mxu0 %v127_v5  ;;  %263 = vmatpush1.msra.mxu1 %v129_v6  ;;  %v114_v11 = vld [vmem:[#allocation2 + $0x120] sm:$0xff]  ;;  %v115_v15 = vld [vmem:[#allocation2 + $0x128] sm:$0xff]  ;;  %v109_v17 = vld [vmem:[#allocation2 + $0xf8] sm:$0xff] }
  0x13   :  { %193 = vmatprep.subr.mxu0 %v121_v7  ;;  %264 = vmatprep.subr.mxu1 %v123_v8  ;;  %v107_v16 = vld [vmem:[#allocation2 + $0xe8] sm:$0xff]  ;;  %v106_v18 = vld [vmem:[#allocation2 + $0xe0] sm:$0xff]  ;;  %v108_v19 = vld [vmem:[#allocation2 + $0xf0] sm:$0xff] }
  0x14   :  { %527 = vset.pattern.permute.xlu0 %v579_v13  ;;  %194 = vmatpush1.msra.mxu0 %v120_v9  ;;  %v100_v20 = vld [vmem:[#allocation2 + $0xb0] sm:$0xff]  ;;  %v102_v21 = vld [vmem:[#allocation2 + $0xc0] sm:$0xff]  ;;  %v99_v22 = vld [vmem:[#allocation2 + $0xa8] sm:$0xff] }
  0x15   :  { %49 = vperm.xlu0 %527, %v35_v2   ;;  %265 = vmatpush1.msra.mxu1 %v122_v10  ;;  %v101_v23 = vld [vmem:[#allocation2 + $0xb8] sm:$0xff]  ;;  %v95_v25 = vld [vmem:[#allocation2 + $0x88] sm:$0xff]  ;;  %v92_v26 = vld [vmem:[#allocation2 + $0x70] sm:$0xff] }
  0x16   :  { %195 = vmatprep.subr.mxu0 %v114_v11  ;;  %266 = vmatprep.subr.mxu1 %v116_v12  ;;  %v93_v24 = vld [vmem:[#allocation2 + $0x78] sm:$0xff]  ;;  %v94_v27 = vld [vmem:[#allocation2 + $0x80] sm:$0xff]  ;;  %v88_v29 = vld [vmem:[#allocation2 + $0x50] sm:$0xff]  ;;  %v136_v11 = vlaneseq }
  0x17   :  { %196 = vmatpush1.msra.mxu0 %v113_v14  ;;  %267 = vmatpush1.msra.mxu1 %v115_v15  ;;  %v86_v28 = vld [vmem:[#allocation2 + $0x40] sm:$0xff]  ;;  %v85_v30 = vld [vmem:[#allocation2 + $0x38] sm:$0xff]  ;;  %v87_v31 = vld [vmem:[#allocation2 + $0x48] sm:$0xff] }
  0x18   :  { %197 = vmatprep.subr.mxu0 %v107_v16  ;;  %268 = vmatprep.subr.mxu1 %v109_v17  ;;  %v79_v32 = vld [vmem:[#allocation2 + $0x8] sm:$0xff]  ;;  %v81_v33 = vld [vmem:[#allocation2 + $0x18] sm:$0xff]  ;;  %v78_v34 = vld [vmem:[#allocation2] sm:$0xff]  ;;  %v137_v12 = vshrl.u32 %v136_v11, 7 }
  0x19   :  { %198 = vmatpush1.msra.mxu0 %v106_v18  ;;  %269 = vmatpush1.msra.mxu1 %v108_v19  ;;  %v80_v35 = vld [vmem:[#allocation2 + $0x10] sm:$0xff]  ;;  %v481_v39 = vld [vmem:[%s656_s1] ss:$0 sm:$0xff]  ;;  %v482_v40 = vld [vmem:[%s656_s1 + $0x1] ss:$0 sm:$0xff] }
  0x1a   :  { %199 = vmatprep.subr.mxu0 %v100_v20  ;;  %270 = vmatprep.subr.mxu1 %v102_v21  ;;  %v132_v36 = vld [vmem:[#allocation2 + $0x1b0] sm:$0xff]  ;;  %v483_v41 = vld [vmem:[%s656_s1 + $0x2] ss:$0 sm:$0xff]  ;;  %v484_v48 = vld [vmem:[%s657_s2] ss:$0 sm:$0xff]  ;;  %v138_v13 = vsub.s32 0, %v137_v12 }
  0x1b   :  { %200 = vmatpush1.msra.mxu0 %v99_v22  ;;  %271 = vmatpush1.msra.mxu1 %v101_v23  ;;  %v131_v52 = vld [vmem:[#allocation2 + $0x1a8] sm:$0xff]  ;;  %v133_v53 = vld [vmem:[#allocation2 + $0x1b8] sm:$0xff]  ;;  %v124_v55 = vld [vmem:[#allocation2 + $0x170] sm:$0xff]  ;;  %v146_v14 = vsub.s32 2, %v137_v12  ;;  %v142_v16 = vsub.s32 1, %v137_v12  ;;  %v150_v17 = vsub.s32 3, %v137_v12 }
  0x1c   :  { %201 = vmatprep.subr.mxu0 %v93_v24  ;;  %272 = vmatprep.subr.mxu1 %v95_v25  ;;  %v125_v54 = vld [vmem:[#allocation2 + $0x178] sm:$0xff]  ;;  %v126_v56 = vld [vmem:[#allocation2 + $0x180] sm:$0xff]  ;;  %v119_v59 = vld [vmem:[#allocation2 + $0x148] sm:$0xff] }
  0x1d   :  { %202 = vmatpush1.msra.mxu0 %v92_v26  ;;  %273 = vmatpush1.msra.mxu1 %v94_v27  ;;  %v118_v57 = vld [vmem:[#allocation2 + $0x140] sm:$0xff]  ;;  %v117_v58 = vld [vmem:[#allocation2 + $0x138] sm:$0xff]  ;;  %v111_v60 = vld [vmem:[#allocation2 + $0x108] sm:$0xff] }
  0x1e   :  { %203 = vmatprep.subr.mxu0 %v86_v28  ;;  %274 = vmatprep.subr.mxu1 %v88_v29  ;;  %v110_v61 = vld [vmem:[#allocation2 + $0x100] sm:$0xff]  ;;  %v112_v62 = vld [vmem:[#allocation2 + $0x110] sm:$0xff]  ;;  %v103_v0 = vld [vmem:[#allocation2 + $0xc8] sm:$0xff] }
  0x1f   :  { %204 = vmatpush1.msra.mxu0 %v85_v30  ;;  %275 = vmatpush1.msra.mxu1 %v87_v31  ;;  %v104_v63 = vld [vmem:[#allocation2 + $0xd0] sm:$0xff]  ;;  %v97_v2 = vld [vmem:[#allocation2 + $0x98] sm:$0xff]  ;;  %v98_v4 = vld [vmem:[#allocation2 + $0xa0] sm:$0xff]  ;;  %v154_v30 = vsub.s32 4, %v137_v12  ;;  %v162_v31 = vsub.s32 6, %v137_v12 }
  0x20   :  { %205 = vmatprep.subr.mxu0 %v79_v32  ;;  %276 = vmatprep.subr.mxu1 %v81_v33  ;;  %v96_v3 = vld [vmem:[#allocation2 + $0x90] sm:$0xff]  ;;  %v90_v5 = vld [vmem:[#allocation2 + $0x60] sm:$0xff]  ;;  %v89_v6 = vld [vmem:[#allocation2 + $0x58] sm:$0xff]  ;;  %v158_v32 = vsub.s32 5, %v137_v12 }
  0x21   :  { %206 = vmatpush1.msra.mxu0 %v78_v34  ;;  %277 = vmatpush1.msra.mxu1 %v80_v35  ;;  %v91_v7 = vld [vmem:[#allocation2 + $0x68] sm:$0xff]  ;;  %v82_v9 = vld [vmem:[#allocation2 + $0x20] sm:$0xff]  ;;  %v84_v10 = vld [vmem:[#allocation2 + $0x30] sm:$0xff] }
  0x22   :  { %239 = vmatprep.mubr.f32.mxu0 %v580_v37  ;;  %310 = vmatprep.mubr.f32.mxu1 %v580_v37  ;;  %v83_v8 = vld [vmem:[#allocation2 + $0x28] sm:$0xff]  ;;  %v134_v15 = vld [vmem:[%s659_s4] sm:$0x7f]  ;;  %s582_s4 = smov [#allocation5]  }
  0x23   :  { %333 = vmatprep.subr.mxu0 %v132_v36  ;;  %498 = vmatprep.subr.mxu1 %v580_v37  ;;  %v139_v18 = vrot.slane %v134_v15, %v138_v13  ;;  %v147_v19 = vrot.slane %v134_v15, %v146_v14  ;;  %v143_v20 = vrot.slane %v134_v15, %v142_v16  ;;  %s472_s8 = sshll.u32 %s582_s4, 4  ;;  %s473_s8 = int_to_ptr.vmem [resolvable:$true] %s472_s8 }
  0x24   :  { %529 = vset.pattern.permute.xlu0 %v578_v1  ;;  %v105_v1 = vld [vmem:[#allocation2 + $0xd8] sm:$0xff]  ;;  %v151_v21 = vrot.slane %v134_v15, %v150_v17  ;;  %v155_v33 = vrot.slane %v134_v15, %v154_v30  ;;  %v163_v34 = vrot.slane %v134_v15, %v162_v31  ;;  %v159_v35 = vrot.slane %v134_v15, %v158_v32  ;;  %s550_s9 = scalar_lea.vmem %s473_s8, 896  ;;  %p555_p6 = scmp.lt.s32.totalorder %s473_s8, %s473_s8 }
  0x25   :  { %p551_p5 = scmp.ne.s32.totalorder %s473_s8, %s550_s9  ;;  %p556_p7 = scmp.lt.s32.totalorder %s550_s9, %s550_s9 }
  0x27   :  { %p557_p8 = por %p556_p7, %p555_p6 }
  0x29   :  { %p558_p9 = pnand %p557_p8, %p551_p5 }
  0x8b   :  { %v40_v38 = vpop.permute.xlu0 %39  ;;  %v61_v42 = vpop.permute.xlu1 %60 }
  0x8c   :  { %v46_v44 = vmul.f32 %v481_v39, %v40_v38  ;;  %v67_v46 = vmul.f32 %v483_v41, %v61_v42 }
  0x90   :  { %v50_v43 = vpop.permute.xlu0 %49 }
  0x91   :  { %v56_v45 = vmul.f32 %v482_v40, %v50_v43 }
  0x93   :  { %v57_v47 = vadd.f32 %v56_v45, %v46_v44 }
  0x95   :  { %v68_v49 = vadd.f32 %v67_v46, %v57_v47 }
  0x97   :  { %v76_v50 = vadd.f32 %v484_v48, %v68_v49 }
  0x99   :  { %v77_v51 = vmax.f32 %v76_v50, 0.0 }
  0x9b   :  { %485 = vmatmul.mubr.msk.f32.vlgmr.msra.gmra.mxu0 %vm171_vm0, %v77_v51  ;;  %486 = vmatmul.mubr.msk.f32.vlgmr.msra.gmra.mxu1 %vm171_vm0, %v77_v51 }
  0x9c   :  { %334 = vmatpush1.msra.mxu0 %v131_v52  ;;  %499 = vmatpush3.msra.mxu1 %v133_v53 }
  0x9d   :  { %335 = vmatprep.subr.mxu0 %v125_v54  ;;  %500 = vmatprep.subr.mxu1 %v580_v37 }
  0x9e   :  { %336 = vmatpush1.msra.mxu0 %v124_v55  ;;  %501 = vmatpush3.msra.mxu1 %v126_v56 }
  0x9f   :  { %337 = vmatprep.subr.mxu0 %v118_v57  ;;  %502 = vmatprep.subr.mxu1 %v580_v37 }
  0xa0   :  { %338 = vmatpush1.msra.mxu0 %v117_v58  ;;  %503 = vmatpush3.msra.mxu1 %v119_v59 }
  0xa1   :  { %339 = vmatprep.subr.mxu0 %v111_v60  ;;  %504 = vmatprep.subr.mxu1 %v580_v37 }
  0xa2   :  { %340 = vmatpush1.msra.mxu0 %v110_v61  ;;  %505 = vmatpush3.msra.mxu1 %v112_v62 }
  0xa3   :  { %341 = vmatprep.subr.mxu0 %v104_v63  ;;  %506 = vmatprep.subr.mxu1 %v580_v37 }
  0xa4   :  { %342 = vmatpush1.msra.mxu0 %v103_v0  ;;  %507 = vmatpush3.msra.mxu1 %v105_v1 }
  0xa5   :  { %343 = vmatprep.subr.mxu0 %v97_v2  ;;  %508 = vmatprep.subr.mxu1 %v580_v37 }
  0xa6   :  { %344 = vmatpush1.msra.mxu0 %v96_v3  ;;  %509 = vmatpush3.msra.mxu1 %v98_v4 }
  0xa7   :  { %345 = vmatprep.subr.mxu0 %v90_v5  ;;  %510 = vmatprep.subr.mxu1 %v580_v37 }
  0xa8   :  { %346 = vmatpush1.msra.mxu0 %v89_v6  ;;  %511 = vmatpush3.msra.mxu1 %v91_v7 }
  0xa9   :  { %347 = vmatprep.subr.mxu0 %v83_v8  ;;  %512 = vmatprep.subr.mxu1 %v580_v37 }
  0xaa   :  { %348 = vmatpush1.msra.mxu0 %v82_v9  ;;  %381 = vmatprep.mubr.f32.mxu0 %v580_v37 }
  0xab   :  { %513 = vmatpush3.msra.mxu1 %v84_v10  ;;  %514 = vmatprep.mubr.msk.f32.mxu1 %vm581_vm1, %v580_v37 }
  0xac   :  { %487 = vmatmul.mubr.msk.f32.vlgmr.msra.gmra.mxu0 %vm171_vm0, %v77_v51  ;;  %515 = vmatmul.mubr.msk.f32.vlgmr.msra.gmra.mxu1 %vm171_vm0, %v77_v51 }
 0x15b   :  { %v241_v22 = vpop.f32.mrf.mxu0  ;;  %v312_v23 = vpop.f32.mrf.mxu1 }
 0x15c   :  { %v242_v24 = vadd.f32 %v241_v22, %v139_v18  ;;  %v313_v25 = vadd.f32 %v312_v23, %v147_v19 }
 0x15d   :  { %v243_v26 = vpop.f32.mrf.mxu0  ;;  %v314_v27 = vpop.f32.mrf.mxu1 }
 0x15e   :  { %458 = vst [vmem:[#allocation5] sm:$0xff] %v242_v24  ;;  %460 = vst [vmem:[#allocation5 + $0x10] sm:$0xff] %v313_v25  ;;  %v244_v28 = vadd.f32 %v243_v26, %v143_v20  ;;  %v315_v29 = vadd.f32 %v314_v27, %v151_v21 }
 0x160   :  { %459 = vst [vmem:[#allocation5 + $0x8] sm:$0xff] %v244_v28  ;;  %461 = vst [vmem:[#allocation5 + $0x18] sm:$0xff] %v315_v29 }
 0x16c   :  { %v383_v36 = vpop.f32.mrf.mxu0  ;;  %v454_v37 = vpop.f32.mrf.mxu1 }
 0x16d   :  { %v384_v38 = vadd.f32 %v383_v36, %v155_v33  ;;  %v455_v39 = vadd.f32 %v454_v37, %v163_v34 }
 0x16e   :  { %v385_v40 = vpop.f32.mrf.mxu0  ;;  %v516_v41 = vpop.f32.mrf.mxu1 }
 0x16f   :  { %462 = vst [vmem:[#allocation5 + $0x20] sm:$0xff] %v384_v38  ;;  %465 = vst.msk [vmem:[#allocation5 + $0x30] sm:$0xff] %vm464_vm2, %v455_v39  ;;  %v386_v42 = vadd.f32 %v385_v40, %v159_v35 }
 0x171   :  { %463 = vst [vmem:[#allocation5 + $0x28] sm:$0xff] %v386_v42 }
 0x172   :  { %561 = shalt.err (!%p558_p9)
}
 0x173   :  { %475 = dma.vmem_to_hbm [thread:$0]  %s473_s8, 896, %s660_s5, [#allocation4]  }
 0x174   :  { %572 = dma.done.wait [#allocation4], 896  }
 0x175   :  { %573 = vsyncadd [#allocation4], 4294966400 }
 0x176   :  { %479 = vsyncpa [#allocation3], 1 }
 0x177   :  { %480 = vsyncpa [#allocation4], 1 }

</bundles_post_ra>
